<compile_context>
chip_gen: v7x
topology: tpu7x:2x2x1
jax: 0.10.0
libtpu: 0.0.40
codegen_flags: <defaults>
</compile_context>

<pallas_src>
import functools

import jax
import jax.numpy as jnp
from jax.experimental import pallas as pl
from jax.experimental.pallas import tpu as pltpu


def _cdiv(a, b):
    return (a + b - 1) // b


def _round_up(v, m):
    return _cdiv(v, m) * m


@functools.lru_cache(maxsize=1)
def _vmem_capacity_bytes():
    """Physical VMEM per core; conservative 64 MiB (v7x) fallback if the query fails."""
    try:
        info = pltpu.get_tpu_info()
        for name in ("vmem_capacity_bytes", "vmem_bytes", "vmem_size_bytes"):
            cap = getattr(info, name, None)
            if cap:
                return int(cap)
    except Exception:
        pass
    return 64 << 20


def _step_vmem_bytes(tb, tk, n_g):
    """Honest per-grid-step VMEM footprint (2x buffers for every pipelined operand)."""
    return (2 * tb * tk * 4        # x tile, f32, double-buffered
            + 2 * tk * n_g * 2     # W12 tile, bf16, double-buffered
            + 2 * tb * n_g * 2     # output slab tile, bf16, double-buffered
            + tb * n_g * 4         # f32 accumulator scratch
            + 2 * n_g * 4)         # bias row (also double-buffered by Pallas)


def _choose_tk(K, n_g, budget):
    """K-reduction tile: full K when it fits the budget, else a 512-multiple that does."""
    tb_ref = 256
    if _step_vmem_bytes(tb_ref, K, n_g) <= budget:
        return K                    # single K block (full-dim block, no padding needed)
    tk = 512
    while tk * 2 < K and _step_vmem_bytes(tb_ref, tk * 2, n_g) <= budget:
        tk *= 2
    return tk


def prepare_params(params, *, C, T):
    """One-time, batch-independent weight fusion & packing (kept out of the forward).

    Returns (packed, tk):
      packed["w12"] : (K_pad, N_g)        bf16  packed [W1 | W2], zero-padded
      packed["b12"] : (1, N_g)            f32   packed [b1' | b2], zero-padded
      packed["wc"]  : (2d, num_classes)   f32   cls weight (applied in XLA, f32)
      packed["bc"]  : (1, num_classes)    f32
      tk            : static int — K-reduction tile used by the kernel grid
    """
    T10 = T // 10
    K = C * T
    wb, bb, w0, b0 = params["wb"], params["bb"], params["w0"], params["b0"]
    wp, bp, wc, bc = params["wp"], params["bp"], params["wc"], params["bc"]
    d = w0.shape[1]

    # Backbone stand-in + proj0 fused (weights only):  f1 = x @ (wb @ w0) + (bb @ w0 + b0)
    w1 = wb @ w0                                         # (K, d)
    b1 = bb @ w0 + b0                                    # (1, d)

    # AvgPool1d(10) * 10 == windowed SUM over time, folded into the proj weight:
    #   W2[c*T + u*10 + j, :] = wp[c*T10 + u, :]   (zeros for any truncated time tail)
    w2 = jnp.repeat(wp.reshape(C, T10, d), 10, axis=1)   # (C, 10*T10, d)
    if T > T10 * 10:
        w2 = jnp.pad(w2, ((0, 0), (0, T - T10 * 10), (0, 0)))
    w2 = w2.reshape(K, d)

    n_g = _round_up(2 * d, 128)
    budget = int(_vmem_capacity_bytes() * 0.55)
    tk = _choose_tk(K, n_g, budget)
    k_pad = K if tk == K else _round_up(K, tk)

    w12 = jnp.concatenate([w1, w2], axis=1)                                  # (K, 2d)
    w12 = jnp.pad(w12, ((0, k_pad - K), (0, n_g - 2 * d))).astype(jnp.bfloat16)
    b12 = jnp.pad(jnp.concatenate([b1, bp], axis=1),
                  ((0, 0), (0, n_g - 2 * d))).astype(jnp.float32)

    packed = dict(w12=w12, b12=b12,
                  wc=wc.astype(jnp.float32), bc=bc.astype(jnp.float32))
    return packed, tk


def ff_kernel(x_ref, w12_ref, b12_ref, out_ref, acc_ref):
    # x_ref  : (TB, TK)   f32   (cast to bf16 here — avoids a separate XLA pass over x)
    # w12_ref: (TK, N_g)  bf16  packed [W1 | W2]
    # b12_ref: (1, N_g)   f32
    # out_ref: (TB, N_g)  bf16  lane-dense slab [f1 | f2 | zero pad]
    # acc_ref: (TB, N_g)  f32   VMEM accumulator scratch
    k = pl.program_id(1)

    @pl.when(k == 0)
    def _():
        acc_ref[...] = jnp.zeros_like(acc_ref)

    acc_ref[...] += jnp.dot(x_ref[...].astype(jnp.bfloat16), w12_ref[...],
                            preferred_element_type=jnp.float32)

    @pl.when(k == pl.num_programs(1) - 1)
    def _():
        out_ref[...] = (acc_ref[...] + b12_ref[...]).astype(out_ref.dtype)


@functools.partial(jax.jit, static_argnames=("tk",))
def ff_forward(x, packed, *, tk):
    # ---- glue: squeeze the dummy channel dim and flatten (row-major, matches torch) ----
    if x.ndim > 3:
        x = jnp.squeeze(x, axis=1)
    B, C, T = x.shape
    K = C * T

    w12, b12, wc, bc = packed["w12"], packed["b12"], packed["wc"], packed["bc"]
    k_pad, n_g = w12.shape
    two_d = wc.shape[0]
    n_k = k_pad // tk

    # ---- generation- / megacore-aware batch tile ----
    vmem_cap = _vmem_capacity_bytes()
    budget = int(vmem_cap * 0.55)
    tb_cap = 16
    while tb_cap * 2 <= 1024 and _step_vmem_bytes(tb_cap * 2, tk, n_g) <= budget:
        tb_cap *= 2
    if B <= 16:
        tb = _round_up(B, 16)
    else:
        # at least 2 batch tiles so both v7x TensorCores get work; as large as fits otherwise
        tb = min(tb_cap, _round_up(_cdiv(B, 2), 16))
    b_pad = _round_up(B, tb)
    n_b = b_pad // tb

    x_flat = x.reshape(B, K).astype(jnp.float32)
    if b_pad != B or k_pad != K:
        x_flat = jnp.pad(x_flat, ((0, b_pad - B), (0, k_pad - K)))

    step_bytes = _step_vmem_bytes(tb, tk, n_g)
    vmem_limit = int(min(max(2 * step_bytes, 32 << 20),
                         int(min(vmem_cap, 128 << 20) * 0.8)))

    cost = pl.CostEstimate(
        flops=2 * b_pad * k_pad * n_g,
        transcendentals=0,
        bytes_accessed=(b_pad * k_pad * 4 + k_pad * n_g * 2
                        + n_g * 4 + b_pad * n_g * 2))

    slab = pl.pallas_call(
        ff_kernel,
        out_shape=jax.ShapeDtypeStruct((b_pad, n_g), jnp.bfloat16),
        grid=(n_b, n_k),
        in_specs=[
            pl.BlockSpec((tb, tk), lambda i, k: (i, k)),     # x: streamed per (batch, K) tile
            pl.BlockSpec((tk, n_g), lambda i, k: (k, 0)),    # W12: varies along K only
            pl.BlockSpec((1, n_g), lambda i, k: (0, 0)),     # b12: constant
        ],
        out_specs=pl.BlockSpec((tb, n_g), lambda i, k: (i, 0)),
        scratch_shapes=[pltpu.VMEM((tb, n_g), jnp.float32)],
        compiler_params=pltpu.CompilerParams(
            dimension_semantics=("parallel", "arbitrary"),
            vmem_limit_bytes=vmem_limit),
        cost_estimate=cost,
    )(x_flat, w12, b12)

    # cls head in f32 on the un-padded slice (tiny; fuses with the slab slicing in XLA).
    f = slab[:B, :two_d].astype(jnp.float32)
    f1 = f[:, :two_d // 2]
    f2 = f[:, two_d // 2:]
    out = f @ wc + bc
    return f1, f2, out


def init_params(key, C, T, feature_dim, d, num_classes):
    T10 = T // 10
    ks = jax.random.split(key, 8)
    s = 0.05
    return dict(
        wb=jax.random.normal(ks[0], (C * T, feature_dim), jnp.float32) * s,
        bb=jax.random.normal(ks[1], (1, feature_dim), jnp.float32) * s,
        w0=jax.random.normal(ks[2], (feature_dim, d), jnp.float32) * s,
        b0=jax.random.normal(ks[3], (1, d), jnp.float32) * s,
        wp=jax.random.normal(ks[4], (T10 * C, d), jnp.float32) * s,
        bp=jax.random.normal(ks[5], (1, d), jnp.float32) * s,
        wc=jax.random.normal(ks[6], (2 * d, num_classes), jnp.float32) * s,
        bc=jax.random.normal(ks[7], (1, num_classes), jnp.float32) * s,
    )


def ref_forward(x, params):
    """Pure-JAX f32 reference mirroring the PyTorch forward (eval mode)."""
    xs = jnp.squeeze(x, axis=1) if x.ndim > 3 else x
    B, C, T = xs.shape
    T10 = T // 10
    xf = xs.reshape(B, C * T)
    feat = xf @ params["wb"] + params["bb"]
    f1 = feat @ params["w0"] + params["b0"]
    pooled = xs[:, :, :T10 * 10].reshape(B, C, T10, 10).mean(-1) * 10.0
    f2 = pooled.reshape(B, C * T10) @ params["wp"] + params["bp"]
    f = jnp.concatenate([f1, f2], axis=-1)
    out = f @ params["wc"] + params["bc"]
    return f1, f2, out


if __name__ == "__main__":
    # Small shapes consistent with the module's forward (time_step % 10 == 0):
    B, C, T = 2, 4, 20            # batch, in_channels, time_step
    feature_dim, d, num_classes = 16, 32, 3

    key = jax.random.PRNGKey(0)
    kx, kp = jax.random.split(key)
    x = jax.random.normal(kx, (B, 1, C, T), jnp.float32)   # (B, 1, C, T) like the module
    params = init_params(kp, C, T, feature_dim, d, num_classes)

    # One-time weight fusion / packing (batch independent), then the streaming forward.
    packed, tk = prepare_params(params, C=C, T=T)
    f1, f2, out = ff_forward(x, packed, tk=tk)
    jax.block_until_ready((f1, f2, out))

    r1, r2, ro = ref_forward(x, params)
    # bf16 MXU operands / bf16 slab -> relaxed tolerances vs. the f32 reference.
    assert jnp.allclose(f1, r1, rtol=2e-2, atol=2e-2)
    assert jnp.allclose(f2, r2, rtol=2e-2, atol=2e-2)
    assert jnp.allclose(out, ro, rtol=2e-2, atol=2e-2)

    print("KERNEL_OK")
</pallas_src>

<mosaic_0001>
module attributes {stable_mosaic.version = 11 : i64} {
  func.func @ff_kernel(%arg0: i32, %arg1: i32, %arg2: memref<16x80xf32, #tpu.memory_space<vmem>>, %arg3: memref<80x128xbf16, #tpu.memory_space<vmem>>, %arg4: memref<1x128xf32, #tpu.memory_space<vmem>>, %arg5: memref<16x128xbf16, #tpu.memory_space<vmem>>, %arg6: memref<16x128xf32, #tpu.memory_space<vmem>>) attributes {dimension_semantics = [#tpu.dimension_semantics<parallel>, #tpu.dimension_semantics<arbitrary>], iteration_bounds = array<i64: 1, 1>, scalar_prefetch = 0 : i64, scratch_operands = 1 : i64, tpu.core_type = #tpu.core_type<tc>, window_params = [{transform_indices = @transform_0, window_bounds = array<i64: 16, 80>}, {transform_indices = @transform_1, window_bounds = array<i64: 80, 128>}, {pipeline_mode = #tpu.pipeline_mode<synchronous>, transform_indices = @transform_2, window_bounds = array<i64: 1, 128>}, {transform_indices = @transform_3, window_bounds = array<i64: 16, 128>}]} {
    %c0_i32 = arith.constant 0 : i32
    %0 = arith.cmpi eq, %arg1, %c0_i32 : i32
    %1 = arith.extui %0 : i1 to i32
    %c0_i32_0 = arith.constant 0 : i32
    %2 = arith.cmpi ne, %1, %c0_i32_0 : i32
    scf.if %2 {
      %cst_10 = arith.constant 0.000000e+00 : f32
      %13 = vector.broadcast %cst_10 : f32 to vector<16x128xf32>
      %c0_11 = arith.constant 0 : index
      %c0_12 = arith.constant 0 : index
      %14 = vector.load %arg6[%c0_11, %c0_12] : memref<16x128xf32, #tpu.memory_space<vmem>>, vector<16x128xf32>
      tpu.vector_store %arg6[%c0_11, %c0_12], %13 {strides = array<i32>} : memref<16x128xf32, #tpu.memory_space<vmem>>, vector<16x128xf32>,
    } else {
    }
    %c0 = arith.constant 0 : index
    %c0_1 = arith.constant 0 : index
    %3 = vector.load %arg6[%c0, %c0_1] : memref<16x128xf32, #tpu.memory_space<vmem>>, vector<16x128xf32>
    %c0_2 = arith.constant 0 : index
    %c0_3 = arith.constant 0 : index
    %4 = vector.load %arg2[%c0_2, %c0_3] : memref<16x80xf32, #tpu.memory_space<vmem>>, vector<16x80xf32>
    %5 = arith.truncf %4 : vector<16x80xf32> to vector<16x80xbf16>
    %c0_4 = arith.constant 0 : index
    %c0_5 = arith.constant 0 : index
    %6 = vector.load %arg3[%c0_4, %c0_5] : memref<80x128xbf16, #tpu.memory_space<vmem>>, vector<80x128xbf16>
    %cst = arith.constant dense<0.000000e+00> : vector<16x128xf32>
    %7 = tpu.matmul %5, %6, %cst {dimension_numbers = #tpu.dot_dimension_numbers<[1], [0], [0], [1], [0, 0, 1, 1], [], []>} : vector<16x80xbf16>, vector<80x128xbf16>, vector<16x128xf32> -> vector<16x128xf32>
    %8 = arith.addf %3, %7 : vector<16x128xf32>
    %c0_6 = arith.constant 0 : index
    %c0_7 = arith.constant 0 : index
    %9 = vector.load %arg6[%c0_6, %c0_7] : memref<16x128xf32, #tpu.memory_space<vmem>>, vector<16x128xf32>
    tpu.vector_store %arg6[%c0_6, %c0_7], %8 {strides = array<i32>} : memref<16x128xf32, #tpu.memory_space<vmem>>, vector<16x128xf32>,
    %c0_i32_8 = arith.constant 0 : i32
    %10 = arith.cmpi eq, %arg1, %c0_i32_8 : i32
    %11 = arith.extui %10 : i1 to i32
    %c0_i32_9 = arith.constant 0 : i32
    %12 = arith.cmpi ne, %11, %c0_i32_9 : i32
    scf.if %12 {
      %c0_10 = arith.constant 0 : index
      %c0_11 = arith.constant 0 : index
      %13 = vector.load %arg6[%c0_10, %c0_11] : memref<16x128xf32, #tpu.memory_space<vmem>>, vector<16x128xf32>
      %c0_12 = arith.constant 0 : index
      %c0_13 = arith.constant 0 : index
      %14 = vector.load %arg4[%c0_12, %c0_13] : memref<1x128xf32, #tpu.memory_space<vmem>>, vector<1x128xf32>
      %15 = vector.broadcast %14 : vector<1x128xf32> to vector<16x128xf32>
      %16 = arith.addf %13, %15 : vector<16x128xf32>
      %17 = arith.truncf %16 : vector<16x128xf32> to vector<16x128xbf16>
      %c0_14 = arith.constant 0 : index
      %c0_15 = arith.constant 0 : index
      %18 = vector.load %arg5[%c0_14, %c0_15] : memref<16x128xbf16, #tpu.memory_space<vmem>>, vector<16x128xbf16>
      tpu.vector_store %arg5[%c0_14, %c0_15], %17 {strides = array<i32>} : memref<16x128xbf16, #tpu.memory_space<vmem>>, vector<16x128xbf16>,
    } else {
    }
    return
  }
  func.func @transform_0(%arg0: i32, %arg1: i32) -> (i32, i32) {
    %c0_i32 = arith.constant 0 : i32
    return %arg0, %arg1 : i32, i32
  }
  func.func @transform_1(%arg0: i32, %arg1: i32) -> (i32, i32) {
    %c0_i32 = arith.constant 0 : i32
    %c0_i32_0 = arith.constant 0 : i32
    return %arg1, %c0_i32 : i32, i32
  }
  func.func @transform_2(%arg0: i32, %arg1: i32) -> (i32, i32) {
    %c0_i32 = arith.constant 0 : i32
    %c0_i32_0 = arith.constant 0 : i32
    %c0_i32_1 = arith.constant 0 : i32
    return %c0_i32, %c0_i32_0 : i32, i32
  }
  func.func @transform_3(%arg0: i32, %arg1: i32) -> (i32, i32) {
    %c0_i32 = arith.constant 0 : i32
    %c0_i32_0 = arith.constant 0 : i32
    return %arg0, %c0_i32 : i32, i32
  }
}

</mosaic_0001>

<bundles_post_ra>
// kernel: squeeze.1
= control target key start
LH: loop header
LB: loop body
LE: loop exit
PB: predicated region body
PF: predicated region fallthrough
CT: control target
= control target key end

     0   :  { %2 = vsyncpa [#allocation1], 0  ;;  %s80_s6 = smov [#allocation0]   ;;  %s109_s0 = inlined_call_operand.hbm [shape: f32[2,1,4,20], index: 0, kind: input, shape index: {}]   ;;  %s110_s1 = inlined_call_operand.vmem [shape: f32[2,80], index: 1, kind: output, shape index: {}]  }
   0x1   :  { %s7_s7 = sshll.u32 %s80_s6, 4  ;;  %s56_s10 = scalar_lea.hbm %s109_s0, 128  ;;  %s8_s7 = int_to_ptr.vmem [resolvable:$true] %s7_s7 }
   0x2   :  { %p57_p0 = scmp.ne.s32.totalorder %s109_s0, %s56_s10  ;;  %p60_p1 = scmp.lt.u32.totalorder %s56_s10, %s109_s0 }
   0x4   :  { %p62_p2 = pnand %p60_p1, %p57_p0 }
   0x6   :  { %65 = shalt.err (!%p62_p2)
}
   0x7   :  { %s66_s15 = scalar_lea.vmem %s8_s7, 128  ;;  %p71_p4 = scmp.lt.s32.totalorder %s8_s7, %s8_s7 }
   0x8   :  { %p67_p3 = scmp.ne.s32.totalorder %s8_s7, %s66_s15  ;;  %p72_p5 = scmp.lt.s32.totalorder %s66_s15, %s66_s15 }
   0xa   :  { %p73_p6 = por %p72_p5, %p71_p4 }
   0xc   :  { %p74_p7 = pnand %p73_p6, %p67_p3 }
   0xe   :  { %77 = shalt.err (!%p74_p7)
}
   0xf   :  { %10 = dma.hbm_to_vmem [thread:$0]  %s109_s0, 128, %s8_s7, [#allocation1]  }
  0x10   :  { %78 = dma.done.wait [#allocation1], 128  }
  0x11   :  { %79 = vsyncadd [#allocation1], 4294967168  ;;  %v15_v0 = vld [vmem:[#allocation0 + $0x4] sm:$0xf]  ;;  %v18_v1 = vld [vmem:[#allocation0] sm:$0xf] }
  0x12   :  { %17 = vst [vmem:[#allocation3 + $0x8] sm:$0xf] %v15_v0  ;;  %19 = vst [vmem:[#allocation3] sm:$0xf] %v18_v1  ;;  %s25_s0 = smov 3  ;;  %s39_s18 = smov 3 }
  0x13   :  { %s20_s19 = smov 3  ;;  %s32_s20 = smov 3  ;;  %vm22_vm0 = vcmask 162816   ;;  %vm29_vm1 = vcmask 654816   ;;  %vm36_vm2 = vcmask 490816   ;;  %vm43_vm3 = vcmask 326816  }
  0x14   :  { %s81_s21 = smov 60   ;;  %s82_s22 = smov 20  }
  0x15   :  { %s83_s23 = smov 40  }
  0x19   :  { %v26_v2 = vld [vmem:[#allocation3 + $0x3] ss:$8 sm:%s25_s0]   ;;  %v40_v3 = vld [vmem:[#allocation3 + $0x1] ss:$8 sm:%s39_s18]   ;;  %v21_v4 = vld [vmem:[#allocation3] ss:$8 sm:%s20_s19]  }
  0x1a   :  { %27 = vrot.lane.b32.xlu0 %v26_v2, %s81_s21  ;;  %41 = vrot.lane.b32.xlu1 %v40_v3, %s82_s22  ;;  %v33_v5 = vld [vmem:[#allocation3 + $0x2] ss:$8 sm:%s32_s20]   ;;  %23 = vst.msk [vmem:[#allocation2] sm:$0x3] %vm22_vm0, %v21_v4  }
  0x1e   :  { %34 = vrot.lane.b32.xlu0 %v33_v5, %s83_s23 }
  0x8c   :  { %v28_v6 = vpop.permute.xlu0 %27   ;;  %v42_v7 = vpop.permute.xlu1 %41  }
  0x8d   :  { %30 = vst.msk [vmem:[#allocation2] sm:$0x3] %vm29_vm1, %v28_v6  }
  0x90   :  { %v35_v8 = vpop.permute.xlu0 %34  }
  0x91   :  { %37 = vst.msk [vmem:[#allocation2] sm:$0x3] %vm36_vm2, %v35_v8  }
  0x92   :  { %44 = vst.msk [vmem:[#allocation2] sm:$0x3] %vm43_vm3, %v42_v7  }
  0x99   :  { %v48_v9 = vld [vmem:[#allocation2] sm:$0x3] }
  0x9a   :  { %50 = vst [vmem:[%s110_s1] sm:$0x3] %v48_v9 }
  0x9b   :  { %51 = vsyncpa [#allocation1], 1 }

// kernel: ff_forward.1
= control target key start
LH: loop header
LB: loop body
LE: loop exit
PB: predicated region body
PF: predicated region fallthrough
CT: control target
= control target key end

     0   :  { %v186_v0 = vmov 0.0   ;;  %vm187_vm0 = vmmov 0   ;;  %vm66_vm1 = vcmask 654336   ;;  %s235_s1 = inlined_call_operand.vmem [shape: bf16[80,128], index: 1, kind: input, shape index: {}]   ;;  %s236_s0 = inlined_call_operand.vmem [shape: f32[16,80], index: 0, kind: input, shape index: {}]   ;;  %s237_s2 = inlined_call_operand.vmem [shape: f32[1,128], index: 2, kind: input, shape index: {}]   ;;  %s238_s3 = inlined_call_operand.vmem [shape: bf16[16,128], index: 3, kind: output, shape index: {}]  }
   0x1   :  { %165 = vmatprep.subr.bf16.mxu0 %v186_v0  ;;  %v181_v1 = vld [vmem:[%s235_s1] sm:$0xff]   ;;  %175 = vmatprep.mubr.msk.bf16.mxu0 %vm187_vm0, %v186_v0  ;;  %v182_v2 = vld [vmem:[%s235_s1 + $0x8] sm:$0xff]   ;;  %v183_v3 = vld [vmem:[%s235_s1 + $0x10] sm:$0xff]  }
   0x2   :  { %166 = vmatpush3.bf16.msra.mxu0 %v181_v1  ;;  %v184_v4 = vld [vmem:[%s235_s1 + $0x18] sm:$0xff]   ;;  %v185_v5 = vld [vmem:[%s235_s1 + $0x20] sm:$0xff]   ;;  %v24_v7 = vld [vmem:[%s236_s0 + $0x8] sm:$0xff] }
   0x3   :  { %167 = vmatprep.subr.bf16.mxu0 %v186_v0  ;;  %v23_v6 = vld [vmem:[%s236_s0] sm:$0xff] }
   0x4   :  { %v25_v8 = vpack.c.bf16 %v24_v7, %v23_v6  ;;  %v149_v10 = vld [vmem:[%s237_s2] ss:$0 sm:$0xff] }
   0x6   :  { %168 = vmatpush3.bf16.msra.mxu0 %v182_v2 }
   0x7   :  { %169 = vmatprep.subr.bf16.mxu0 %v186_v0 }
   0xa   :  { %170 = vmatpush3.bf16.msra.mxu0 %v183_v3 }
   0xb   :  { %171 = vmatprep.subr.bf16.mxu0 %v186_v0 }
   0xe   :  { %172 = vmatpush3.bf16.msra.mxu0 %v184_v4 }
   0xf   :  { %173 = vmatprep.subr.bf16.mxu0 %v186_v0 }
  0x12   :  { %174 = vmatpush3.bf16.msra.mxu0 %v185_v5 }
  0x15   :  { %176 = vmatmul.mubr.msk.bf16.vlgmr.msra.gmra.mrb[0].mxu0 %vm66_vm1, %v25_v8 }
  0xe8   :  { %v104_v9 = vpop.f32.mrb[0].mxu0 }
  0xe9   :  { %v177_v11 = vpop.f32.mrb[1].mxu0  ;;  %v127_v13 = vadd.f32 %v149_v10, %v104_v9 }
  0xea   :  { %v107_v12 = vpop.f32.mrb[2].mxu0 }
  0xeb   :  { %v128_v14 = vadd.f32 %v149_v10, %v107_v12  ;;  %v178_v15 = vpop.f32.mrb[3].mxu0 }
  0xed   :  { %v157_v16 = vpack.c.bf16 %v128_v14, %v127_v13 }
  0xef   :  { %158 = vst [vmem:[%s238_s3] sm:$0xff] %v157_v16  }

</bundles_post_ra>
